<compile_context>
chip_gen: v7x
topology: tpu7x:2x2x1
jax: 0.10.0
libtpu: 0.0.40
codegen_flags: <defaults>
</compile_context>

<pallas_src>
import jax
import jax.numpy as jnp
import numpy as np
from jax.experimental import pallas as pl
from jax.experimental.pallas import tpu as pltpu

_PAD_COORD = 1.0e6  # sentinel coordinate for padded points: never wins the
                    # per-cell min and its softmax term underflows to 0.


def make_post_prob_kernel(sigma, bg_ratio):
    neg_inv_two_sigma2 = -1.0 / (2.0 * float(sigma) ** 2)
    bg_ratio = float(bg_ratio)

    def kernel(x_ref, y_ref, cx_ref, cy_ref, st_ref, pts_ref, bg_ref):
        b = pl.program_id(0)
        x = x_ref[0]          # (Pp, 1)
        y = y_ref[0]          # (Pp, 1)
        cx = cx_ref[...]      # (1, TCC)  x-coordinate of each flattened cell
        cy = cy_ref[...]      # (1, TCC)  y-coordinate of each flattened cell

        # Squared distance of every point to every flattened grid cell.
        # Fused (x-c)^2 + (y-c)^2 form: ~4 VPU ops/elem instead of ~8 for the
        # -2xc + x^2 + c^2 expansion, fewer (Pp, TCC) temporaries, and no
        # catastrophic-cancellation noise near dis ~ 0.
        dx = x - cx
        dy = y - cy
        dis = dx * dx + dy * dy                                          # (Pp, TCC)

        # Background-distance row (per-cell min over points; clamp kept for
        # faithfulness to the torch code even though fused dis is >= 0).
        min_dis = jnp.maximum(jnp.min(dis, axis=0, keepdims=True), 0.0)  # (1, TCC)
        st = st_ref[b]
        bg_dis = (st * bg_ratio) ** 2 / (min_dis + 1e-5)                 # (1, TCC)

        # Softmax over the (P points + 1 background) axis, per spatial cell.
        # Because neg_inv_two_sigma2 < 0 and dis >= 0, the per-cell max of the
        # point logits is exactly min_dis * neg_inv_two_sigma2 — reuse the min
        # reduction instead of a second XLU reduction over (Pp, TCC).
        lp = dis * neg_inv_two_sigma2                                    # (Pp, TCC)
        lb = bg_dis * neg_inv_two_sigma2                                 # (1, TCC)
        m = jnp.maximum(min_dis * neg_inv_two_sigma2, lb)                # (1, TCC)
        ep = jnp.exp(lp - m)
        eb = jnp.exp(lb - m)
        # Exact reciprocal kept (pl.reciprocal(approx=True) adds ~2^-12 error
        # for negligible gain on a (1, TCC) row).
        inv_denom = 1.0 / (jnp.sum(ep, axis=0, keepdims=True) + eb)      # (1, TCC)

        pts_ref[0] = ep * inv_denom        # sublane-aligned, lane-dense store
        bg_ref[0] = eb * inv_denom         # separate (1, TCC) background row

    return kernel


def _pick_cc_tile(CC, Pp, target=2048, budget_bytes=8 * 1024 * 1024):
    """Largest multiple of 128 dividing CC that keeps the per-step working set
    (~6 f32 copies of a (Pp, tcc) slab: double-buffered output + temporaries)
    under `budget_bytes`, capped at `target` lanes."""
    per_lane_bytes = 6 * max(Pp, 8) * 4
    cap = max(128, (budget_bytes // per_lane_bytes) // 128 * 128)
    target = min(target, cap)
    if CC <= target:
        return CC
    t = (min(target, CC) // 128) * 128
    while t >= 128:
        if CC % t == 0:
            return t
        t -= 128
    return CC


def post_prob_forward(points_xy, st_sizes, cood, *, sigma=8.0, bg_ratio=1.0,
                      tcc=None):
    """points_xy: (B, P, 2) f32; st_sizes: (B,) f32; cood: (C,) f32.
    Returns (prob_points (B, P, C*C), prob_bg (B, 1, C*C)); concatenating
    along axis 1 gives the per-image (P+1, C*C) posterior of the torch module.
    """
    B, P, _ = points_xy.shape
    C = cood.shape[0]
    CC = C * C

    # Pad the point axis up to a multiple of 8 (sublane) with sentinels so all
    # reductions and stores run on full 8-row sublane tiles.
    Pp = ((P + 7) // 8) * 8
    if tcc is None:
        tcc = _pick_cc_tile(CC, Pp)
    assert CC % tcc == 0 and (tcc % 128 == 0 or tcc == CC)

    pts = points_xy.astype(jnp.float32)
    if Pp != P:
        pad = jnp.full((B, Pp - P, 2), _PAD_COORD, dtype=jnp.float32)
        pts = jnp.concatenate([pts, pad], axis=1)
    xs = pts[:, :, 0:1]                                   # (B, Pp, 1)
    ys = pts[:, :, 1:2]                                   # (B, Pp, 1)

    # Flattened cell coordinates: cell (a, b) -> index a*C + b.
    cood = cood.astype(jnp.float32)
    cood_y_flat = jnp.repeat(cood, C).reshape(1, CC)      # cood[a]
    cood_x_flat = jnp.tile(cood, (C,)).reshape(1, CC)     # cood[b]

    kernel = make_post_prob_kernel(sigma, bg_ratio)

    prob_pts, prob_bg = pl.pallas_call(
        kernel,
        out_shape=(jax.ShapeDtypeStruct((B, Pp, CC), jnp.float32),
                   jax.ShapeDtypeStruct((B, 1, CC), jnp.float32)),
        grid=(B, CC // tcc),
        in_specs=[
            pl.BlockSpec((1, Pp, 1), lambda b, j: (b, 0, 0)),      # x
            pl.BlockSpec((1, Pp, 1), lambda b, j: (b, 0, 0)),      # y
            pl.BlockSpec((1, tcc), lambda b, j: (0, j)),           # cood_x_flat
            pl.BlockSpec((1, tcc), lambda b, j: (0, j)),           # cood_y_flat
            pl.BlockSpec(memory_space=pltpu.MemorySpace.SMEM),     # st_sizes
        ],
        out_specs=(
            pl.BlockSpec((1, Pp, tcc), lambda b, j: (b, 0, j)),    # point probs
            pl.BlockSpec((1, 1, tcc), lambda b, j: (b, 0, j)),     # background
        ),
        compiler_params=pltpu.CompilerParams(
            dimension_semantics=("parallel", "parallel"),
            vmem_limit_bytes=48 * 1024 * 1024,   # headroom on v7x (64 MiB VMEM)
        ),
    )(xs, ys, cood_x_flat, cood_y_flat, st_sizes.astype(jnp.float32))

    if Pp != P:
        prob_pts = prob_pts[:, :P, :]   # drop sentinel rows (all ~0)
    return prob_pts, prob_bg


def post_prob_reference(points_xy, st_sizes, cood, *, sigma=8.0, bg_ratio=1.0):
    """Pure-JAX transcription of the PyTorch forward (fixed P points/image).
    Uses the algebraically identical (x-c)^2 distance form (the torch
    -2xc + x^2 + c^2 expansion differs only by float round-off)."""
    B, P, _ = points_xy.shape
    C = cood.shape[0]
    x = points_xy[:, :, 0:1]                              # (B, P, 1)
    y = points_xy[:, :, 1:2]
    coo = cood.reshape(1, 1, C)
    x_dis = (x - coo) ** 2                                # (B, P, C)
    y_dis = (y - coo) ** 2                                # (B, P, C)
    dis = y_dis[:, :, :, None] + x_dis[:, :, None, :]     # (B, P, C, C)
    dis = dis.reshape(B, P, C * C)
    min_dis = jnp.maximum(jnp.min(dis, axis=1, keepdims=True), 0.0)
    bg = (st_sizes.reshape(B, 1, 1) * bg_ratio) ** 2 / (min_dis + 1e-5)
    full = jnp.concatenate([dis, bg], axis=1)             # (B, P+1, C*C)
    logits = -full / (2.0 * sigma ** 2)
    return jax.nn.softmax(logits, axis=1)


if __name__ == "__main__":
    # small, TPU-friendly config: c_size=128, stride=8 -> C=16, C*C=256
    sigma = 8.0
    bg_ratio = 1.0
    c_size = 128
    stride = 8
    C = c_size // stride
    B, P = 2, 10          # P not a multiple of 8: exercises sentinel padding

    cood = jnp.arange(0, c_size, stride, dtype=jnp.float32) + stride / 2.0  # (C,)

    key = jax.random.PRNGKey(0)
    k1, k2 = jax.random.split(key)
    points = jax.random.uniform(k1, (B, P, 2), jnp.float32) * c_size        # (B, P, 2)
    st_sizes = jax.random.uniform(k2, (B,), jnp.float32,
                                  minval=64.0, maxval=float(c_size))

    # tcc=128 so the flattened-cell grid axis actually tiles (grid = (2, 2)).
    prob_pts, prob_bg = post_prob_forward(points, st_sizes, cood,
                                          sigma=sigma, bg_ratio=bg_ratio,
                                          tcc=128)
    prob_pts, prob_bg = jax.block_until_ready((prob_pts, prob_bg))
    out = jnp.concatenate([prob_pts, prob_bg], axis=1)    # (B, P+1, C*C)

    ref = post_prob_reference(points, st_sizes, cood, sigma=sigma,
                              bg_ratio=bg_ratio)

    # The Pallas kernel's exp path (TPU EUP, ~2^-12 rel error) differs slightly
    # from XLA's softmax exp; previously observed max rel diff ~2.5e-4, so the
    # check uses a tolerance that covers that while still verifying ~3 digits.
    np.testing.assert_allclose(np.asarray(out), np.asarray(ref),
                               rtol=2e-3, atol=1e-5)

    print("KERNEL_OK")
</pallas_src>

<mosaic_0001>
module attributes {stable_mosaic.version = 11 : i64} {
  func.func @kernel(%arg0: i32, %arg1: i32, %arg2: memref<1x16x1xf32, #tpu.memory_space<vmem>>, %arg3: memref<1x16x1xf32, #tpu.memory_space<vmem>>, %arg4: memref<1x128xf32, #tpu.memory_space<vmem>>, %arg5: memref<1x128xf32, #tpu.memory_space<vmem>>, %arg6: memref<2xf32, #tpu.memory_space<smem>>, %arg7: memref<1x16x128xf32, #tpu.memory_space<vmem>>, %arg8: memref<1x1x128xf32, #tpu.memory_space<vmem>>) attributes {dimension_semantics = [#tpu.dimension_semantics<parallel>, #tpu.dimension_semantics<parallel>], iteration_bounds = array<i64: 2, 2>, scalar_prefetch = 0 : i64, scratch_operands = 0 : i64, tpu.core_type = #tpu.core_type<tc>, window_params = [{transform_indices = @transform_0, window_bounds = array<i64: 1, 16, 1>}, {transform_indices = @transform_1, window_bounds = array<i64: 1, 16, 1>}, {transform_indices = @transform_2, window_bounds = array<i64: 1, 128>}, {transform_indices = @transform_3, window_bounds = array<i64: 1, 128>}, {transform_indices = @transform_4, window_bounds = array<i64: 2>}, {transform_indices = @transform_5, window_bounds = array<i64: 1, 16, 128>}, {transform_indices = @transform_6, window_bounds = array<i64: 1, 1, 128>}]} {
    %c0 = arith.constant 0 : index
    %c0_0 = arith.constant 0 : index
    %c0_1 = arith.constant 0 : index
    %0 = vector.load %arg2[%c0, %c0_0, %c0_1] : memref<1x16x1xf32, #tpu.memory_space<vmem>>, vector<1x16x1xf32>
    %1 = vector.shape_cast %0 : vector<1x16x1xf32> to vector<16x1xf32>
    %c0_2 = arith.constant 0 : index
    %c0_3 = arith.constant 0 : index
    %c0_4 = arith.constant 0 : index
    %2 = vector.load %arg3[%c0_2, %c0_3, %c0_4] : memref<1x16x1xf32, #tpu.memory_space<vmem>>, vector<1x16x1xf32>
    %3 = vector.shape_cast %2 : vector<1x16x1xf32> to vector<16x1xf32>
    %c0_5 = arith.constant 0 : index
    %c0_6 = arith.constant 0 : index
    %4 = vector.load %arg4[%c0_5, %c0_6] : memref<1x128xf32, #tpu.memory_space<vmem>>, vector<1x128xf32>
    %c0_7 = arith.constant 0 : index
    %c0_8 = arith.constant 0 : index
    %5 = vector.load %arg5[%c0_7, %c0_8] : memref<1x128xf32, #tpu.memory_space<vmem>>, vector<1x128xf32>
    %6 = vector.broadcast %1 : vector<16x1xf32> to vector<16x128xf32>
    %7 = vector.broadcast %4 : vector<1x128xf32> to vector<16x128xf32>
    %8 = arith.subf %6, %7 : vector<16x128xf32>
    %9 = vector.broadcast %3 : vector<16x1xf32> to vector<16x128xf32>
    %10 = vector.broadcast %5 : vector<1x128xf32> to vector<16x128xf32>
    %11 = arith.subf %9, %10 : vector<16x128xf32>
    %12 = arith.mulf %8, %8 : vector<16x128xf32>
    %13 = arith.mulf %11, %11 : vector<16x128xf32>
    %14 = arith.addf %12, %13 : vector<16x128xf32>
    %cst = arith.constant dense<0x7F800000> : vector<128xf32>
    %15 = vector.multi_reduction <minimumf>, %14, %cst [0] : vector<16x128xf32> to vector<128xf32>
    %16 = vector.shape_cast %15 : vector<128xf32> to vector<1x128xf32>
    %cst_9 = arith.constant 0.000000e+00 : f32
    %17 = vector.broadcast %cst_9 : f32 to vector<1x128xf32>
    %18 = arith.maximumf %16, %17 : vector<1x128xf32>
    %19 = arith.index_cast %arg0 : i32 to index
    %20 = memref.load %arg6[%19] : memref<2xf32, #tpu.memory_space<smem>>
    %cst_10 = arith.constant 1.000000e+00 : f32
    %21 = arith.mulf %20, %cst_10 : f32
    %22 = arith.mulf %21, %21 : f32
    %cst_11 = arith.constant 9.99999974E-6 : f32
    %23 = vector.broadcast %cst_11 : f32 to vector<1x128xf32>
    %24 = arith.addf %18, %23 : vector<1x128xf32>
    %25 = vector.broadcast %22 : f32 to vector<1x128xf32>
    %26 = arith.divf %25, %24 : vector<1x128xf32>
    %cst_12 = arith.constant -7.812500e-03 : f32
    %27 = vector.broadcast %cst_12 : f32 to vector<16x128xf32>
    %28 = arith.mulf %14, %27 : vector<16x128xf32>
    %cst_13 = arith.constant -7.812500e-03 : f32
    %29 = vector.broadcast %cst_13 : f32 to vector<1x128xf32>
    %30 = arith.mulf %26, %29 : vector<1x128xf32>
    %cst_14 = arith.constant -7.812500e-03 : f32
    %31 = vector.broadcast %cst_14 : f32 to vector<1x128xf32>
    %32 = arith.mulf %18, %31 : vector<1x128xf32>
    %33 = arith.maximumf %32, %30 : vector<1x128xf32>
    %34 = vector.broadcast %33 : vector<1x128xf32> to vector<16x128xf32>
    %35 = arith.subf %28, %34 : vector<16x128xf32>
    %36 = math.exp %35 : vector<16x128xf32>
    %37 = arith.subf %30, %33 : vector<1x128xf32>
    %38 = math.exp %37 : vector<1x128xf32>
    %cst_15 = arith.constant dense<0.000000e+00> : vector<128xf32>
    %39 = vector.multi_reduction <add>, %36, %cst_15 [0] : vector<16x128xf32> to vector<128xf32>
    %40 = vector.shape_cast %39 : vector<128xf32> to vector<1x128xf32>
    %41 = arith.addf %40, %38 : vector<1x128xf32>
    %cst_16 = arith.constant 1.000000e+00 : f32
    %42 = vector.broadcast %cst_16 : f32 to vector<1x128xf32>
    %43 = arith.divf %42, %41 : vector<1x128xf32>
    %44 = vector.broadcast %43 : vector<1x128xf32> to vector<16x128xf32>
    %45 = arith.mulf %36, %44 : vector<16x128xf32>
    %c0_17 = arith.constant 0 : index
    %c0_18 = arith.constant 0 : index
    %c0_19 = arith.constant 0 : index
    %46 = vector.load %arg7[%c0_17, %c0_18, %c0_19] : memref<1x16x128xf32, #tpu.memory_space<vmem>>, vector<1x16x128xf32>
    %47 = vector.shape_cast %46 : vector<1x16x128xf32> to vector<16x128xf32>
    %48 = vector.shape_cast %45 : vector<16x128xf32> to vector<1x16x128xf32>
    tpu.vector_store %arg7[%c0_17, %c0_18, %c0_19], %48 {strides = array<i32>} : memref<1x16x128xf32, #tpu.memory_space<vmem>>, vector<1x16x128xf32>,
    %49 = arith.mulf %38, %43 : vector<1x128xf32>
    %c0_20 = arith.constant 0 : index
    %c0_21 = arith.constant 0 : index
    %c0_22 = arith.constant 0 : index
    %50 = vector.load %arg8[%c0_20, %c0_21, %c0_22] : memref<1x1x128xf32, #tpu.memory_space<vmem>>, vector<1x1x128xf32>
    %51 = vector.shape_cast %50 : vector<1x1x128xf32> to vector<1x128xf32>
    %52 = vector.shape_cast %49 : vector<1x128xf32> to vector<1x1x128xf32>
    tpu.vector_store %arg8[%c0_20, %c0_21, %c0_22], %52 {strides = array<i32>} : memref<1x1x128xf32, #tpu.memory_space<vmem>>, vector<1x1x128xf32>,
    return
  }
  func.func @transform_0(%arg0: i32, %arg1: i32) -> (i32, i32, i32) {
    %c0_i32 = arith.constant 0 : i32
    %c0_i32_0 = arith.constant 0 : i32
    %c0_i32_1 = arith.constant 0 : i32
    return %arg0, %c0_i32, %c0_i32_0 : i32, i32, i32
  }
  func.func @transform_1(%arg0: i32, %arg1: i32) -> (i32, i32, i32) {
    %c0_i32 = arith.constant 0 : i32
    %c0_i32_0 = arith.constant 0 : i32
    %c0_i32_1 = arith.constant 0 : i32
    return %arg0, %c0_i32, %c0_i32_0 : i32, i32, i32
  }
  func.func @transform_2(%arg0: i32, %arg1: i32) -> (i32, i32) {
    %c0_i32 = arith.constant 0 : i32
    %c0_i32_0 = arith.constant 0 : i32
    return %c0_i32, %arg1 : i32, i32
  }
  func.func @transform_3(%arg0: i32, %arg1: i32) -> (i32, i32) {
    %c0_i32 = arith.constant 0 : i32
    %c0_i32_0 = arith.constant 0 : i32
    return %c0_i32, %arg1 : i32, i32
  }
  func.func @transform_4(%arg0: i32, %arg1: i32) -> i32 {
    %c0_i32 = arith.constant 0 : i32
    %c0_i32_0 = arith.constant 0 : i32
    return %c0_i32 : i32
  }
  func.func @transform_5(%arg0: i32, %arg1: i32) -> (i32, i32, i32) {
    %c0_i32 = arith.constant 0 : i32
    %c0_i32_0 = arith.constant 0 : i32
    return %arg0, %c0_i32, %arg1 : i32, i32, i32
  }
  func.func @transform_6(%arg0: i32, %arg1: i32) -> (i32, i32, i32) {
    %c0_i32 = arith.constant 0 : i32
    %c0_i32_0 = arith.constant 0 : i32
    return %arg0, %c0_i32, %arg1 : i32, i32, i32
  }
}

</mosaic_0001>

<bundles_post_ra>
// kernel: tpu_custom_call.1
= control target key start
LH: loop header
LB: loop body
LE: loop exit
PB: predicated region body
PF: predicated region fallthrough
CT: control target
= control target key end

     0   :  { %s1132_s0 = inlined_call_operand.vmem [shape: f32[2,16,1], index: 0, kind: input, shape index: {}]   ;;  %s1133_s1 = inlined_call_operand.vmem [shape: f32[2,16,1], index: 1, kind: input, shape index: {}]   ;;  %s1134_s2 = inlined_call_operand.vmem [shape: f32[1,256], index: 2, kind: input, shape index: {}]   ;;  %s1135_s3 = inlined_call_operand.vmem [shape: f32[1,256], index: 3, kind: input, shape index: {}]   ;;  %s1136_s4 = inlined_call_operand.vmem [shape: f32[2], index: 4, kind: input, shape index: {}]   ;;  %s1137_s5 = inlined_call_operand.hbm [shape: f32[2,16,256], index: 5, kind: output, shape index: {0}]   ;;  %s1138_s6 = inlined_call_operand.hbm [shape: f32[2,1,256], index: 6, kind: output, shape index: {1}]  }
   0x1   :  { %1139 = sst [smem:[#allocation11_spill]] %s1132_s0 }
   0x2   :  { %1140 = sst [smem:[#allocation12_spill]] %s1133_s1 }
   0x3   :  { %1141 = sst [smem:[#allocation13_spill]] %s1134_s2 }
   0x4   :  { %1142 = sst [smem:[#allocation14_spill]] %s1135_s3 }
   0x5   :  { %12 = vsyncpa [#allocation4], 0 }
   0x6   :  { %13 = vsyncpa [#allocation3], 0 }
   0x7   :  { %15 = vsyncpa [#allocation3 + $0x1], 0 }
   0x8   :  { %16 = vsyncpa [#allocation7], 0 }
   0x9   :  { %18 = vsyncpa [#allocation7 + $0x1], 0  ;;  %s926_s21 = smov 0   ;;  %s928_s22 = smov 0  }
   0xa   :  { %s930_s23 = smov 0   ;;  %s932_s24 = smov 0  }
   0xb   :  { %s934_s25 = smov 0   ;;  %s936_s26 = smov 0  }
   0xc   :  { %s938_s27 = smov 0   ;;  %s940_s28 = smov 0  }
   0xd LB: > { %s611_s29 = sadd.s32 4294967295, %s882_s28   ;;  %s612_s30 = sadd.s32 4294967294, %s882_s28   ;;  %s882_s28 = sphi %s940_s28, %s24_s28   ;;  %s878_s27 = sphi %s938_s27, %s1158_s27   ;;  %s874_s26 = sphi %s936_s26, %s1157_s26   ;;  %s870_s25 = sphi %s934_s25, %s1156_s25   ;;  %s866_s24 = sphi %s932_s24, %s1155_s24   ;;  %s862_s23 = sphi %s930_s23, %s1154_s23   ;;  %s858_s22 = sphi %s928_s22, %s1153_s22   ;;  %s854_s21 = sphi %s926_s21, %s1152_s21  }
   0xe   : > { %s33_s7 = sadd.s32 1, %s874_s26  ;;  %s36_s8 = sadd.s32 1, %s878_s27 }
   0xf   : > { %p34_p0 = scmp.ge.s32.totalorder %s33_s7, 2  ;;  %s170_s9 = sadd.s32 1, %s862_s23 }
  0x10   : > { %p180_p1 = scmp.ne.s32.totalorder %s862_s23, %s858_s22  ;;  %p181_p2 = scmp.eq.s32.totalorder %s611_s29, 3 }
  0x11   : > { %s1160_s7 = smov (%p34_p0, %s33_s7), 0  ;;  %s1162_s8 = smov (!%p34_p0, %s36_s8), %s878_s27 }
  0x12   : > { %s166_s10 = ssub.s32 %s874_s26, %s1160_s7  ;;  %p978_p3 = por %p181_p2, %p180_p1 }
  0x13   : > { %p38_p4 = scmp.ge.s32.totalorder %s1162_s8, 2  ;;  %p186_p5 = scmp.ne.s32.totalorder %s858_s22, %s854_s21 }
  0x14   : > { %p187_p6 = scmp.eq.s32.totalorder %s612_s30, 3  ;;  %p613_p7 = scmp.ge.s32.totalorder %s882_s28, 1 }
  0x15   : > { %s1164_s8 = smov (%p38_p4, %s1162_s8), 0  ;;  %p222_p9 = scmp.lt.s32.totalorder %s882_s28, 5 }
  0x16   : > { %p987_p8 = por %p187_p6, %p186_p5  ;;  %s165_s13 = ssub.s32 %s878_s27, %s1164_s8 }
  0x17   : > { %s167_s14 = sor.u32 %s166_s10, %s165_s13  ;;  %p994_p10 = pnand %p613_p7, %p222_p9 }
  0x18   : > { %s1144_s12 = scalar_select %p987_p8, 1, 0 }
  0x19   : > { %p168_p11 = scmp.eq.s32.totalorder %s167_s14, 0  ;;  %p998_p12 = scmp.eq.s32.totalorder %s611_s29, 0 }
  0x1a   : > { %p642_p13 = pneg %p994_p10  ;;  %s235_s19 = sshll.u32 %s1136_s4, 4  ;;  %s236_s19 = int_to_ptr.vmem [resolvable:$true] %s235_s19 }
  0x1b   : > { %s1008_s20 = scalar_select %p168_p11, %s862_s23, %s170_s9  }
  0x1c   : > { %p643_p0 = pnand %p998_p12, %p642_p13  ;;  %s737_s30 = scalar_lea.vmem %s236_s19, 16 }
  0x1d   : > { %p738_p1 = scmp.ne.s32.totalorder %s236_s19, %s737_s30  ;;  %p745_p6 = scmp.lt.s32.totalorder %s236_s19, %s236_s19 }
  0x1e   : > { %p739_p2 = pneg %p643_p0  ;;  %p746_p7 = scmp.lt.s32.totalorder %s737_s30, %s737_s30 }
  0x20   : > { %p740_p4 = pnand %p739_p2, %p738_p1  ;;  %p747_p9 = por %p746_p7, %p745_p6 }
  0x22   : > { %p741_p5 = pneg %p740_p4 }
  0x24   : > { %p748_p8 = pnand %p747_p9, %p741_p5 }
  0x26   : > { %751 = shalt.err (!%p748_p8)
}
  0x27   : > { %s884_s29 = smov [#allocation2]   ;;  %276 = sbr.rel (%p994_p10) target bundleno = 315 (0x13b), region = 40 }
  0x28   : > { %645 = dma.vmem_to_smem (!%p643_p0), %s236_s19, 16, %s884_s29, [#allocation4]  }
  0x2e   : > { %841 = dma.done.wait (%p998_p12), [#allocation4], 16  }
  0x2f   : > { %843 = vsyncadd (%p998_p12), [#allocation4], 4294967280 }
  0x30   : > { %282 = sfence }
  0x31   : > { %p322_p11 = scmp.lt.s32.totalorder %s870_s25, 1  ;;  %v885_v0 = vmov 0   ;;  %s1147_s1 = sld [smem:[#allocation12_spill]] }
  0x32   : > { %726 = vset.pattern.permute.xlu1 %v885_v0  ;;  %725 = vset.pattern.permute.xlu0 %v885_v0  ;;  %s1148_s0 = sld [smem:[#allocation11_spill]]  ;;  %p332_p8 = scmp.lt.s32.totalorder %s866_s24, 1 }
  0x33   : > { %s323_s9 = scalar_select %p322_p11, %s870_s25, 1 }
  0x34   : > { %s333_s19 = scalar_select %p332_p8, %s866_s24, 1 }
  0x35   : > { %s632_s10 = sshll.u32 %s323_s9, 4  ;;  %s1149_s3 = sld [smem:[#allocation14_spill]] }
  0x36   : > { %s1150_s2 = sld [smem:[#allocation13_spill]]  ;;  %s626_s18 = sshll.u32 %s870_s25, 2 }
  0x37   : > { %s331_s15 = scalar_lea.vmem %s1147_s1, %s632_s10 }
  0x38   : > { %s326_s16 = scalar_lea.vmem %s1148_s0, %s632_s10  ;;  %v340_v1 = vld [vmem:[%s331_s15] sm:$0xff]  ;;  %v341_v3 = vld [vmem:[%s331_s15 + $0x8] sm:$0xff]  ;;  %s1036_s15 = sand.u32 1, %s858_s22  }
  0x39   : > { %v338_v2 = vld [vmem:[%s326_s16] sm:$0xff]  ;;  %364 = vperm.xlu1 %726, %v340_v1   ;;  %v339_v4 = vld [vmem:[%s326_s16 + $0x8] sm:$0xff]  ;;  %s618_s17 = sshll.u32 %s1036_s15, 4  ;;  %s446_s16 = sadd.s32 %s866_s24, %s626_s18 }
  0x3a   : > { %346 = vperm.xlu0 %725, %v338_v2   ;;  %s627_s30 = sshll.u32 %s446_s16, 7  ;;  %s315_s29 = scalar_lea.vmem [#allocation5], %s618_s17 }
  0x3b   : > { %s337_s9 = scalar_lea.vmem %s1149_s3, %s333_s19  ;;  %s431_s18 = scalar_lea.sflag [#allocation3], %s1036_s15 }
  0x3c   : > { %s334_s1 = scalar_lea.vmem %s1150_s2, %s333_s19  ;;  %v624_v5 = vld [vmem:[%s337_s9] ss:$0 sm:$0xff]  ;;  %s628_s19 = sshll.u32 %s870_s25, 1 }
  0x3d   : > { %369 = vperm.xlu1 %726, %v341_v3   ;;  %v623_v6 = vld [vmem:[%s334_s1] ss:$0 sm:$0xff]  ;;  %s394_s1 = sld [smem:[#allocation2 + %s870_s25]]  ;;  %s449_s9 = sshll.u32 %s315_s29, 4  ;;  %s1048_s9 = int_to_ptr.vmem [resolvable:$true] %s449_s9 }
  0x3e   : > { %351 = vperm.xlu0 %725, %v339_v4   ;;  %s463_s13 = sadd.s32 %s866_s24, %s628_s19  ;;  %s321_s2 = scalar_lea.vmem [#allocation6], %s1036_s15 }
  0x3f   : > { %s629_s0 = sshll.u32 %s463_s13, 4  ;;  %s467_s3 = sshll.u32 %s321_s2, 4  ;;  %s1056_s3 = int_to_ptr.vmem [resolvable:$true] %s467_s3 }
  0x40   : > { %s1054_s17 = scalar_lea.hbm %s1138_s6, %s629_s0  ;;  %s752_s16 = scalar_lea.vmem %s1048_s9, 256 }
  0x41   : > { %p753_p10 = scmp.ne.s32.totalorder %s1048_s9, %s752_s16  ;;  %s886_s19 = smov [#allocation5]  }
  0x43   : > { %s395_s10 = smul.f32 %s394_s1, %s394_s1  ;;  %p754_p12 = pnand %p753_p10, %p978_p3 }
  0x45   : > { %v397_v30 = vstv %s395_s10  ;;  %s1046_s10 = scalar_lea.hbm %s1137_s5, %s627_s30  ;;  %p755_p13 = pneg %p754_p12 }
  0x46   : > { %s756_s30 = sshll.u32 %s886_s19, 4  ;;  %s757_s30 = int_to_ptr.vmem [resolvable:$false] %s756_s30 }
  0x47   : > { %s758_s13 = scalar_lea.vmem %s757_s30, 512  ;;  %p759_p0 = scmp.lt.s32.totalorder %s1048_s9, %s757_s30 }
  0x48   : > { %p760_p1 = scmp.lt.s32.totalorder %s758_s13, %s752_s16 }
  0x4a   : > { %p761_p2 = por %p760_p1, %p759_p0 }
  0x4c   : > { %p762_p4 = pnand %p761_p2, %p755_p13 }
  0xb8   : > { %v365_v7 = vpop.permute.xlu1 %364 }
  0xb9   : > { %v347_v8 = vpop.permute.xlu0 %346  ;;  %v378_v9 = vsub.f32 %v365_v7, %v624_v5 }
  0xba   : > { %v360_v10 = vsub.f32 %v347_v8, %v623_v6 }
  0xbb   : > { %v382_v13 = vmul.f32 %v378_v9, %v378_v9 }
  0xbc   : > { %v370_v11 = vpop.permute.xlu1 %369  ;;  %v380_v14 = vmul.f32 %v360_v10, %v360_v10 }
  0xbd   : > { %v352_v12 = vpop.permute.xlu0 %351  ;;  %v379_v15 = vsub.f32 %v370_v11, %v624_v5 }
  0xbe   : > { %v361_v16 = vsub.f32 %v352_v12, %v623_v6  ;;  %v384_v19 = vadd.f32 %v382_v13, %v380_v14 }
  0xbf   : > { %v383_v17 = vmul.f32 %v379_v15, %v379_v15 }
  0xc0   : > { %v381_v18 = vmul.f32 %v361_v16, %v361_v16  ;;  %v400_v35 = vmul.f32 -0.0078125, %v384_v19 }
  0xc2   : > { %v385_v20 = vadd.f32 %v383_v17, %v381_v18 }
  0xc4   : > { %v386_v21 = vmin.f32 %v384_v19, %v385_v20  ;;  %v401_v36 = vmul.f32 -0.0078125, %v385_v20 }
  0xc6   : > { %v387_v22 = vrot.slane %v386_v21, 4 }
  0xc8   : > { %v388_v23 = vmin.f32 %v386_v21, %v387_v22 }
  0xca   : > { %v389_v24 = vrot.slane %v388_v23, 2 }
  0xcc   : > { %v390_v25 = vmin.f32 %v388_v23, %v389_v24 }
  0xce   : > { %v391_v26 = vrot.slane %v390_v25, 1 }
  0xd0   : > { %v392_v27 = vmin.f32 %v390_v25, %v391_v26 }
  0xd2   : > { %v393_v28 = vmax.f32 %v392_v27, 0.0 }
  0xd4   : > { %v396_v29 = vadd.f32 1e-05, %v393_v28  ;;  %v403_v34 = vmul.f32 -0.0078125, %v393_v28 }
  0xd6   : > { %727 = vrcp.f32 %v396_v29 }
  0xe0   : > { %v728_v31 = vpop.eup %727 }
  0xe1   : > { %v399_v32 = vmul.f32 %v728_v31, %v397_v30 }
  0xe3   : > { %v402_v33 = vmul.f32 -0.0078125, %v399_v32 }
  0xe5   : > { %v404_v37 = vmax.f32 %v403_v34, %v402_v33 }
  0xe7   : > { %v405_v38 = vsub.f32 %v400_v35, %v404_v37  ;;  %v406_v39 = vsub.f32 %v401_v36, %v404_v37  ;;  %v411_v42 = vsub.f32 %v402_v33, %v404_v37 }
  0xe9   : > { %v407_v40 = vmul.f32 1.442695, %v405_v38  ;;  %v409_v41 = vmul.f32 1.442695, %v406_v39  ;;  %v412_v45 = vmul.f32 1.442695, %v411_v42 }
  0xeb   : > { %729 = vpow2.f32 %v407_v40 }
  0xec   : > { %731 = vpow2.f32 %v409_v41 }
  0xed   : > { %733 = vpow2.f32 %v412_v45 }
  0xf5   : > { %v730_v43 = vpop.eup %729 }
  0xf6   : > { %v732_v44 = vpop.eup %731 }
  0xf7   : > { %v414_v46 = vadd.f32 %v732_v44, %v730_v43  ;;  %v734_v53 = vpop.eup %733 }
  0xf9   : > { %v415_v47 = vrot.slane %v414_v46, 4 }
  0xfb   : > { %v416_v48 = vadd.f32 %v415_v47, %v414_v46 }
  0xfd   : > { %v417_v49 = vrot.slane %v416_v48, 2 }
  0xff   : > { %v418_v50 = vadd.f32 %v417_v49, %v416_v48 }
 0x101   : > { %v419_v51 = vrot.slane %v418_v50, 1 }
 0x103   : > { %v420_v52 = vadd.f32 %v419_v51, %v418_v50 }
 0x105   : > { %v421_v54 = vadd.f32 %v734_v53, %v420_v52 }
 0x107   : > { %735 = vrcp.f32 %v421_v54 }
 0x111   : > { %v736_v55 = vpop.eup %735 }
 0x112   : > { %v424_v56 = vmul.f32 %v736_v55, %v730_v43  ;;  %v425_v57 = vmul.f32 %v736_v55, %v732_v44  ;;  %v428_v58 = vmul.f32 %v736_v55, %v734_v53 }
 0x114   : > { %426 = vst [vmem:[%s315_s29] sm:$0xff] %v424_v56  ;;  %427 = vst [vmem:[%s315_s29 + $0x8] sm:$0xff] %v425_v57 }
 0x115   : > { %429 = vst [vmem:[%s321_s2] sm:$0x1] %v428_v58 }
 0x116   : > { %765 = shalt.err (!%p762_p4)
}
 0x117   : > { %s766_s0 = scalar_lea.hbm %s1046_s10, 256  ;;  %s770_s14 = scalar_lea.hbm %s1137_s5, 1024 }
 0x118   : > { %p767_p5 = scmp.ne.s32.totalorder %s1046_s10, %s766_s0  ;;  %p771_p9 = scmp.lt.u32.totalorder %s1046_s10, %s1137_s5 }
 0x119   : > { %p772_p11 = scmp.lt.u32.totalorder %s770_s14, %s766_s0  ;;  %p774_p10 = scmp.lt.u32.totalorder %s766_s0, %s1046_s10 }
 0x11a   : > { %p768_p6 = pnand %p767_p5, %p978_p3 }
 0x11b   : > { %p773_p8 = por %p772_p11, %p771_p9 }
 0x11c   : > { %p769_p7 = pneg %p768_p6 }
 0x11d   : > { %p775_p12 = por %p774_p10, %p773_p8 }
 0x11f   : > { %p776_p13 = pnand %p775_p12, %p769_p7 }
 0x121   : > { %779 = shalt.err (!%p776_p13)
}
 0x122   : > { %s887_s24 = smov 128   ;;  %s888_s16 = smov 256  }
 0x123   : > { %s889_s19 = smov 8   ;;  %s436_s30 = scalar_lea.sflag [#allocation7], %s1036_s15 }
 0x124   : > { %638 = dma.vmem_to_hbm [thread:$0]  (%p978_p3), %s1048_s9, 256, %s1046_s10, %s431_s18, %s887_s24, %s888_s16, %s889_s19  }
 0x125   : > { %s780_s13 = scalar_lea.vmem %s1056_s3, 16  ;;  %s890_s0 = smov [#allocation6]  }
 0x126   : > { %p781_p0 = scmp.ne.s32.totalorder %s1056_s3, %s780_s13  ;;  %s784_s2 = sshll.u32 %s890_s0, 4  ;;  %s785_s2 = int_to_ptr.vmem [resolvable:$false] %s784_s2 }
 0x127   : > { %s786_s29 = scalar_lea.vmem %s785_s2, 32  ;;  %p787_p4 = scmp.lt.s32.totalorder %s1056_s3, %s785_s2 }
 0x128   : > { %p782_p1 = pnand %p781_p0, %p978_p3  ;;  %p788_p5 = scmp.lt.s32.totalorder %s786_s29, %s780_s13 }
 0x12a   : > { %p783_p2 = pneg %p782_p1  ;;  %p789_p6 = por %p788_p5, %p787_p4 }
 0x12c   : > { %p790_p7 = pnand %p789_p6, %p783_p2 }
 0x12e   : > { %793 = shalt.err (!%p790_p7)
}
 0x12f   : > { %s794_s15 = scalar_lea.hbm %s1054_s17, 16  ;;  %s798_s18 = scalar_lea.hbm %s1138_s6, 64 }
 0x130   : > { %p795_p9 = scmp.ne.s32.totalorder %s1054_s17, %s794_s15  ;;  %p799_p10 = scmp.lt.u32.totalorder %s1054_s17, %s1138_s6 }
 0x131   : > { %p800_p12 = scmp.lt.u32.totalorder %s798_s18, %s794_s15  ;;  %p802_p0 = scmp.lt.u32.totalorder %s794_s15, %s1054_s17 }
 0x132   : > { %p796_p11 = pnand %p795_p9, %p978_p3 }
 0x133   : > { %p801_p13 = por %p800_p12, %p799_p10 }
 0x134   : > { %p797_p8 = pneg %p796_p11 }
 0x135   : > { %p803_p1 = por %p802_p0, %p801_p13 }
 0x137   : > { %p804_p2 = pnand %p803_p1, %p797_p8 }
 0x139   : > { %807 = shalt.err (!%p804_p2)
}
 0x13a   : > { %639 = dma.vmem_to_hbm [thread:$0]  (%p978_p3), %s1056_s3, 16, %s1054_s17, %s436_s30  }
 0x13b PF: > { %p655_p4 = scmp.ge.s32.totalorder %s882_s28, 2  ;;  %s479_s25 = sand.u32 1, %s854_s21  }
 0x13c   : > { %p1151_p5 = scmp.ne.s32.totalorder %s1144_s12, 0  ;;  %s480_s24 = scalar_lea.sflag [#allocation3], %s479_s25 }
 0x13e   : > { %p647_p6 = pnand %p655_p4, %p1151_p5 }
 0x140   : > { %845 = dma.done.wait (!%p647_p6), %s480_s24, 256  }
 0x141   : > { %847 = vsyncadd (!%p647_p6), %s480_s24, 4294967040  ;;  %s489_s16 = scalar_lea.sflag [#allocation7], %s479_s25 }
 0x142   : > { %849 = dma.done.wait (!%p647_p6), %s489_s16, 16  }
 0x143   : > { %851 = vsyncadd (!%p647_p6), %s489_s16, 4294967280  ;;  %s24_s28 = sadd.s32 1, %s882_s28   ;;  %s1152_s21 = smov %s858_s22 }
 0x144   : > { %p21_p7 = scmp.ge.s32.totalorder %s24_s28, 6   ;;  %s1153_s22 = smov %s862_s23 }
 0x145   : > { %s1154_s23 = smov %s1008_s20  ;;  %s1155_s24 = smov %s874_s26 }
 0x146   : > { %s1156_s25 = smov %s878_s27  ;;  %s1157_s26 = smov %s1160_s7 }
 0x147   : > { %s1158_s27 = smov %s1164_s8  ;;  %23 = sbr.rel (!%p21_p7) target bundleno = 13 (0xd), region = 106 }
 0x14e   :  { %493 = vsyncpa [#allocation3], 1 }
 0x14f   :  { %495 = vsyncpa [#allocation3 + $0x1], 1 }
 0x150   :  { %496 = vsyncpa [#allocation7], 1 }
 0x151   :  { %498 = vsyncpa [#allocation7 + $0x1], 1 }
 0x152   :  { %499 = vsyncpa [#allocation4], 1 }
 0x153   :  { %501 = vsyncpa [#allocation4 + $0x1], 1 }

</bundles_post_ra>
